<compile_context>
chip_gen: v6e
topology: v6e:2x2x1
jax: 0.10.0
libtpu: 0.0.40
codegen_flags: <defaults>
</compile_context>

<pallas_src>
import math

import jax
import jax.numpy as jnp
from jax.experimental import pallas as pl
from jax.experimental.pallas import tpu as pltpu


def _prelu(x, a):
    return jnp.where(x > 0, x, a * x)


def _build_kernel(compute_dtype, n):
    """Kernel body.  `n` is the per-batch sequence length; activation rows are a
    fold of bb batches on the sublane axis (M = bb*n rows)."""

    def kernel(prelu_ref,            # SMEM (4,)   PReLU slopes (f32)
               a_ref,                # (1, M, M)   block-diagonal adjacency
               sup_ref,              # (1, M, H)   V @ Wgc  (precomputed)
               bgc_ref,              # (1, H)
               w1_ref, b1_ref,       # (3*H, 15), (1, 15)
               w2_ref, b2_ref,       # (3*15, 15), (1, 15)
               w3_ref, b3_ref,       # (3*15, 15), (1, 15)
               wl_ref,               # (3*15, 128) zero-padded, no bias
               out_ref):             # (1, M, 128)
        m = sup_ref.shape[1]

        def mm(a, b):
            # Matmul inputs are pre-cast in the wrapper; astype is a no-op for
            # them and only converts the f32 intermediate activations.
            return jnp.dot(a.astype(compute_dtype), b.astype(compute_dtype),
                           preferred_element_type=jnp.float32)

        # Sequence-boundary masks, hoisted once for all four conv layers.
        # They zero both the conv pad rows and the batch-boundary wrap
        # introduced by folding bb batches onto the sublane axis (which is
        # what makes the fold legal).
        seq = jax.lax.broadcasted_iota(jnp.int32, (m, 1), 0) % n
        first_row = seq == 0
        last_row = seq == (n - 1)

        # GraphConvolution: ONE block-diagonal (M,M)@(M,H) MXU push replaces
        # bb tiny per-batch matmuls + a sublane concat.
        x = mm(a_ref[0], sup_ref[0])
        x = _prelu(x + bgc_ref[...], prelu_ref[0])

        def conv3(x, w_ref, bias, slope):
            # Conv1d(k=3, pad=1) along the folded sequence axis as ONE matmul
            # against the lane-concat [x[i-1] | x[i] | x[i+1]].  Rolls stay on
            # the XLU slot; masks kill pad rows / batch wrap.
            xm1 = jnp.where(first_row, 0.0, pltpu.roll(x, shift=1, axis=0))
            xp1 = jnp.where(last_row, 0.0, pltpu.roll(x, shift=m - 1, axis=0))
            xc = jnp.concatenate([xm1, x, xp1], axis=1)       # (M, 3*Cin)
            y = mm(xc, w_ref[...])
            if bias is not None:
                y = y + bias
            if slope is not None:
                y = _prelu(y, slope)
            return y

        x = conv3(x, w1_ref, b1_ref[...], prelu_ref[1])       # (M, 15)
        x = conv3(x, w2_ref, b2_ref[...], prelu_ref[2])
        x = conv3(x, w3_ref, b3_ref[...], prelu_ref[3])
        # Final conv weight is zero-padded to 128 output lanes so this is a
        # single unmasked lane-dense store.
        out_ref[0] = conv3(x, wl_ref, None, None)             # (M, 128)

    return kernel


def hargcnn_forward(V, A, params, *, compute_dtype=jnp.float32,
                    batch_block=None):
    B, N, F = V.shape
    H = params["wgc"].shape[1]
    filt = params["w1"].shape[2]
    nlab = params["wl"].shape[2]
    nlab_pad = ((nlab + 127) // 128) * 128

    # Batch folding: bb batches per grid step.  Keep >=2 grid steps when B>=2
    # (both v7x TensorCores get work), cap at 8 batches/step, and zero-pad the
    # tail instead of degrading to bb=1 on awkward B.
    if batch_block is not None:
        bb = max(1, batch_block)
    else:
        bb = max(1, pl.cdiv(B, max(2, pl.cdiv(B, 8))))
    G = pl.cdiv(B, bb)
    B_pad = G * bb
    M = bb * N

    # Hoisted batch-independent matmul: one dense (B*N, F) @ (F, H) in XLA.
    support = jnp.einsum("bnf,fh->bnh", V, params["wgc"], precision="highest")

    if B_pad > B:
        pad = ((0, B_pad - B), (0, 0), (0, 0))
        support = jnp.pad(support, pad)
        A = jnp.pad(A, pad)

    # Block-diagonal adjacency per grid step: the GCN for bb folded batches
    # becomes one (M,M)@(M,H) matmul.  M*M*4 bytes/step = 64 KB at bb=8,N=16.
    if bb == 1:
        a_blk = A
    else:
        a4 = A.reshape(G, bb, N, N)
        eye = jnp.eye(bb, dtype=A.dtype)
        a_blk = jnp.einsum("gbij,bc->gbicj", a4, eye).reshape(G, M, M)
    sup_blk = support.reshape(G, M, H)

    # Pre-pack conv weights: (3, Cin, Cout) -> (3*Cin, Cout) so each conv is a
    # single MXU push against the lane-concat [x[i-1]|x[i]|x[i+1]].
    w1p = params["w1"].reshape(3 * H, filt)
    w2p = params["w2"].reshape(3 * filt, filt)
    w3p = params["w3"].reshape(3 * filt, filt)
    wlp = jnp.pad(params["wl"].reshape(3 * filt, nlab),
                  ((0, 0), (0, nlab_pad - nlab)))      # lane-dense output

    # bf16 path (native MXU rate on all of v5e/v6e/v7x): cast the matmul
    # inputs in the wrapper so they DMA at half width; accumulation, bias and
    # PReLU stay f32.
    if jnp.dtype(compute_dtype) != jnp.dtype(jnp.float32):
        a_blk = a_blk.astype(compute_dtype)
        sup_blk = sup_blk.astype(compute_dtype)
        w1p = w1p.astype(compute_dtype)
        w2p = w2p.astype(compute_dtype)
        w3p = w3p.astype(compute_dtype)
        wlp = wlp.astype(compute_dtype)

    def full(shape):
        nd = len(shape)
        return pl.BlockSpec(shape, lambda g, _nd=nd: (0,) * _nd)

    # Advisory cost so XLA schedules/overlaps this tiny custom call sensibly.
    flops = 2 * G * M * (M * H + 3 * H * filt + 2 * 3 * filt * filt
                         + 3 * filt * nlab_pad)
    bytes_accessed = int(
        a_blk.size * a_blk.dtype.itemsize
        + sup_blk.size * sup_blk.dtype.itemsize
        + sum(w.size * w.dtype.itemsize for w in (w1p, w2p, w3p, wlp))
        + (params["bgc"].size + params["b1"].size + params["b2"].size
           + params["b3"].size + 4) * 4
        + G * M * nlab_pad * 4)
    cost = pl.CostEstimate(flops=flops, transcendentals=0,
                           bytes_accessed=bytes_accessed)

    out = pl.pallas_call(
        _build_kernel(compute_dtype, N),
        out_shape=jax.ShapeDtypeStruct((G, M, nlab_pad), jnp.float32),
        grid=(G,),
        in_specs=[
            pl.BlockSpec(memory_space=pltpu.MemorySpace.SMEM),  # prelu slopes
            pl.BlockSpec((1, M, M), lambda g: (g, 0, 0)),       # block-diag A
            pl.BlockSpec((1, M, H), lambda g: (g, 0, 0)),       # support
            full((1, H)),                                       # bgc
            full((3 * H, filt)), full((1, filt)),               # w1p, b1
            full((3 * filt, filt)), full((1, filt)),            # w2p, b2
            full((3 * filt, filt)), full((1, filt)),            # w3p, b3
            full((3 * filt, nlab_pad)),                         # wlp (padded)
        ],
        out_specs=pl.BlockSpec((1, M, nlab_pad), lambda g: (g, 0, 0)),
        compiler_params=pltpu.CompilerParams(
            dimension_semantics=("parallel",)),
        cost_estimate=cost,
    )(params["prelu"], a_blk, sup_blk, params["bgc"],
      w1p, params["b1"], w2p, params["b2"], w3p, params["b3"], wlp)

    # (G, M, 128) -> (B_pad, N, 128) is a free major-axis regrouping; drop the
    # batch/lane padding and return PyTorch NCW layout (B, 12, N).
    out = out.reshape(B_pad, N, nlab_pad)[:B, :, :nlab]
    return jnp.transpose(out, (0, 2, 1))


def hargcnn_reference(V, A, params):
    """Pure-JAX reference with identical math (for a sanity check)."""
    p = params["prelu"]
    x = jnp.einsum("bnf,fh->bnh", V, params["wgc"], precision="highest")
    x = jnp.einsum("bnm,bmh->bnh", A, x, precision="highest") + params["bgc"]
    x = jnp.where(x > 0, x, p[0] * x)

    def conv(x, w, b, s):
        N = x.shape[1]
        xp = jnp.pad(x, ((0, 0), (1, 1), (0, 0)))
        y = sum(jnp.einsum("bnc,co->bno", xp[:, k:k + N, :], w[k],
                           precision="highest") for k in range(3))
        if b is not None:
            y = y + b
        if s is not None:
            y = jnp.where(y > 0, y, s * y)
        return y

    x = conv(x, params["w1"], params["b1"], p[1])
    x = conv(x, params["w2"], params["b2"], p[2])
    x = conv(x, params["w3"], params["b3"], p[3])
    x = conv(x, params["wl"], None, None)
    return jnp.transpose(x, (0, 2, 1))


def init_params(key, nfeat, nhid, filters=15, nlabels=12):
    ks = jax.random.split(key, 10)
    stdv = 1.0 / math.sqrt(nhid)

    def conv_w(k, cin, cout):
        bound = 1.0 / math.sqrt(cin * 3)
        # stored as (K=3, Cin, Cout): transposed PyTorch (Cout, Cin, K) layout
        return jax.random.uniform(k, (3, cin, cout), jnp.float32, -bound, bound)

    def conv_b(k, cin, cout):
        bound = 1.0 / math.sqrt(cin * 3)
        return jax.random.uniform(k, (1, cout), jnp.float32, -bound, bound)

    return {
        "prelu": jnp.full((4,), 0.25, jnp.float32),   # PReLU default init
        "wgc": jax.random.uniform(ks[0], (nfeat, nhid), jnp.float32, -stdv, stdv),
        "bgc": jax.random.uniform(ks[1], (1, nhid), jnp.float32, -stdv, stdv),
        "w1": conv_w(ks[2], nhid, filters),
        "b1": conv_b(ks[3], nhid, filters),
        "w2": conv_w(ks[4], filters, filters),
        "b2": conv_b(ks[5], filters, filters),
        "w3": conv_w(ks[6], filters, filters),
        "b3": conv_b(ks[7], filters, filters),
        "wl": conv_w(ks[8], filters, nlabels),        # cnn_label has bias=False
    }


if __name__ == "__main__":
    B, N, nfeat, nhid = 2, 16, 8, 32
    key = jax.random.PRNGKey(0)
    kV, kA, kP = jax.random.split(key, 3)

    V = jax.random.normal(kV, (B, N, nfeat), jnp.float32)
    A = jax.random.uniform(kA, (B, N, N), jnp.float32)

    params = init_params(kP, nfeat, nhid)

    # Default f32 MXU inputs for parity with the PyTorch model; pass
    # compute_dtype=jnp.bfloat16 for half-width DMA + native MXU rate (use a
    # looser tolerance, ~5e-2, in that mode).
    out = jax.block_until_ready(hargcnn_forward(V, A, params))
    ref = jax.block_until_ready(hargcnn_reference(V, A, params))

    assert out.shape == (B, 12, N), out.shape
    err = float(jnp.max(jnp.abs(out - ref)))
    assert err < 1e-2, f"max abs error too large: {err}"
    print("KERNEL_OK")
</pallas_src>

<mosaic_0001>
module attributes {stable_mosaic.version = 11 : i64} {
  func.func @kernel(%arg0: i32, %arg1: memref<4xf32, #tpu.memory_space<smem>>, %arg2: memref<1x16x16xf32, #tpu.memory_space<vmem>>, %arg3: memref<1x16x32xf32, #tpu.memory_space<vmem>>, %arg4: memref<1x32xf32, #tpu.memory_space<vmem>>, %arg5: memref<96x15xf32, #tpu.memory_space<vmem>>, %arg6: memref<1x15xf32, #tpu.memory_space<vmem>>, %arg7: memref<45x15xf32, #tpu.memory_space<vmem>>, %arg8: memref<1x15xf32, #tpu.memory_space<vmem>>, %arg9: memref<45x15xf32, #tpu.memory_space<vmem>>, %arg10: memref<1x15xf32, #tpu.memory_space<vmem>>, %arg11: memref<45x128xf32, #tpu.memory_space<vmem>>, %arg12: memref<1x16x128xf32, #tpu.memory_space<vmem>>) attributes {dimension_semantics = [#tpu.dimension_semantics<parallel>], iteration_bounds = array<i64: 2>, scalar_prefetch = 0 : i64, scratch_operands = 0 : i64, tpu.core_type = #tpu.core_type<tc>, window_params = [{transform_indices = @transform_0, window_bounds = array<i64: 4>}, {transform_indices = @transform_1, window_bounds = array<i64: 1, 16, 16>}, {transform_indices = @transform_2, window_bounds = array<i64: 1, 16, 32>}, {pipeline_mode = #tpu.pipeline_mode<synchronous>, transform_indices = @transform_3, window_bounds = array<i64: 1, 32>}, {pipeline_mode = #tpu.pipeline_mode<synchronous>, transform_indices = @transform_4, window_bounds = array<i64: 96, 15>}, {pipeline_mode = #tpu.pipeline_mode<synchronous>, transform_indices = @transform_5, window_bounds = array<i64: 1, 15>}, {pipeline_mode = #tpu.pipeline_mode<synchronous>, transform_indices = @transform_6, window_bounds = array<i64: 45, 15>}, {pipeline_mode = #tpu.pipeline_mode<synchronous>, transform_indices = @transform_7, window_bounds = array<i64: 1, 15>}, {pipeline_mode = #tpu.pipeline_mode<synchronous>, transform_indices = @transform_8, window_bounds = array<i64: 45, 15>}, {pipeline_mode = #tpu.pipeline_mode<synchronous>, transform_indices = @transform_9, window_bounds = array<i64: 1, 15>}, {pipeline_mode = #tpu.pipeline_mode<synchronous>, transform_indices = @transform_10, window_bounds = array<i64: 45, 128>}, {transform_indices = @transform_11, window_bounds = array<i64: 1, 16, 128>}]} {
    %0 = tpu.iota {dimensions = array<i32: 0>} : vector<16x1xi32>
    %c16_i32 = arith.constant 16 : i32
    %c0_i32 = arith.constant 0 : i32
    %1 = arith.cmpi eq, %c16_i32, %c0_i32 : i32
    %c1_i32 = arith.constant 1 : i32
    %2 = arith.select %1, %c1_i32, %c16_i32 : i32
    %3 = vector.broadcast %2 : i32 to vector<16x1xi32>
    %4 = arith.remsi %0, %3 : vector<16x1xi32>
    %c0_i32_0 = arith.constant 0 : i32
    %5 = vector.broadcast %c0_i32_0 : i32 to vector<16x1xi32>
    %6 = arith.cmpi ne, %4, %5 : vector<16x1xi32>
    %c0_i32_1 = arith.constant 0 : i32
    %7 = vector.broadcast %c0_i32_1 : i32 to vector<16x1xi32>
    %8 = arith.cmpi slt, %4, %7 : vector<16x1xi32>
    %c0_i32_2 = arith.constant 0 : i32
    %9 = arith.cmpi slt, %2, %c0_i32_2 : i32
    %10 = vector.broadcast %9 : i1 to vector<16x1xi1>
    %11 = vector.broadcast %10 : vector<16x1xi1> to vector<16x1xi1>
    %12 = arith.xori %8, %11 : vector<16x1xi1>
    %13 = arith.andi %12, %6 : vector<16x1xi1>
    %14 = vector.broadcast %2 : i32 to vector<16x1xi32>
    %15 = arith.addi %4, %14 : vector<16x1xi32>
    %16 = arith.select %13, %15, %4 : vector<16x1xi1>, vector<16x1xi32>
    %c0_i32_3 = arith.constant 0 : i32
    %17 = vector.broadcast %c0_i32_3 : i32 to vector<16x1xi32>
    %18 = arith.cmpi eq, %16, %17 : vector<16x1xi32>
    %c15_i32 = arith.constant 15 : i32
    %19 = vector.broadcast %c15_i32 : i32 to vector<16x1xi32>
    %20 = arith.cmpi eq, %16, %19 : vector<16x1xi32>
    %c0 = arith.constant 0 : index
    %c0_4 = arith.constant 0 : index
    %c0_5 = arith.constant 0 : index
    %21 = vector.load %arg2[%c0, %c0_4, %c0_5] : memref<1x16x16xf32, #tpu.memory_space<vmem>>, vector<1x16x16xf32>
    %22 = vector.shape_cast %21 : vector<1x16x16xf32> to vector<16x16xf32>
    %c0_6 = arith.constant 0 : index
    %c0_7 = arith.constant 0 : index
    %c0_8 = arith.constant 0 : index
    %23 = vector.load %arg3[%c0_6, %c0_7, %c0_8] : memref<1x16x32xf32, #tpu.memory_space<vmem>>, vector<1x16x32xf32>
    %24 = vector.shape_cast %23 : vector<1x16x32xf32> to vector<16x32xf32>
    %cst = arith.constant dense<0.000000e+00> : vector<16x32xf32>
    %25 = tpu.matmul %22, %24, %cst {dimension_numbers = #tpu.dot_dimension_numbers<[1], [0], [0], [1], [0, 0, 1, 1], [], []>} : vector<16x16xf32>, vector<16x32xf32>, vector<16x32xf32> -> vector<16x32xf32>
    %c0_9 = arith.constant 0 : index
    %c0_10 = arith.constant 0 : index
    %26 = vector.load %arg4[%c0_9, %c0_10] : memref<1x32xf32, #tpu.memory_space<vmem>>, vector<1x32xf32>
    %27 = vector.broadcast %26 : vector<1x32xf32> to vector<16x32xf32>
    %28 = arith.addf %25, %27 : vector<16x32xf32>
    %c0_11 = arith.constant 0 : index
    %29 = memref.load %arg1[%c0_11] : memref<4xf32, #tpu.memory_space<smem>>
    %cst_12 = arith.constant 0.000000e+00 : f32
    %30 = vector.broadcast %cst_12 : f32 to vector<16x32xf32>
    %31 = arith.cmpf ogt, %28, %30 : vector<16x32xf32>
    %32 = vector.broadcast %29 : f32 to vector<16x32xf32>
    %33 = arith.mulf %32, %28 : vector<16x32xf32>
    %34 = arith.select %31, %28, %33 : vector<16x32xi1>, vector<16x32xf32>
    %c0_13 = arith.constant 0 : index
    %c0_14 = arith.constant 0 : index
    %35 = vector.load %arg6[%c0_13, %c0_14] : memref<1x15xf32, #tpu.memory_space<vmem>>, vector<1x15xf32>
    %c1 = arith.constant 1 : index
    %36 = memref.load %arg1[%c1] : memref<4xf32, #tpu.memory_space<smem>>
    %c1_i32_15 = arith.constant 1 : i32
    %37 = tpu.dynamic_rotate %34 by %c1_i32_15 dim 0 : vector<16x32xf32>, i32 -> vector<16x32xf32>
    %cst_16 = arith.constant 0.000000e+00 : f32
    %38 = vector.shape_cast %18 : vector<16x1xi1> to vector<16x1xi1>
    %39 = vector.broadcast %38 : vector<16x1xi1> to vector<16x32xi1>
    %40 = vector.broadcast %cst_16 : f32 to vector<16x32xf32>
    %41 = arith.select %39, %40, %37 : vector<16x32xi1>, vector<16x32xf32>
    %c15_i32_17 = arith.constant 15 : i32
    %42 = tpu.dynamic_rotate %34 by %c15_i32_17 dim 0 : vector<16x32xf32>, i32 -> vector<16x32xf32>
    %cst_18 = arith.constant 0.000000e+00 : f32
    %43 = vector.shape_cast %20 : vector<16x1xi1> to vector<16x1xi1>
    %44 = vector.broadcast %43 : vector<16x1xi1> to vector<16x32xi1>
    %45 = vector.broadcast %cst_18 : f32 to vector<16x32xf32>
    %46 = arith.select %44, %45, %42 : vector<16x32xi1>, vector<16x32xf32>
    %47 = tpu.concatenate %41, %34, %46 in 1 : vector<16x32xf32>, vector<16x32xf32>, vector<16x32xf32> -> vector<16x96xf32>
    %c0_19 = arith.constant 0 : index
    %c0_20 = arith.constant 0 : index
    %48 = vector.load %arg5[%c0_19, %c0_20] : memref<96x15xf32, #tpu.memory_space<vmem>>, vector<96x15xf32>
    %cst_21 = arith.constant dense<0.000000e+00> : vector<16x15xf32>
    %49 = tpu.matmul %47, %48, %cst_21 {dimension_numbers = #tpu.dot_dimension_numbers<[1], [0], [0], [1], [0, 0, 1, 1], [], []>} : vector<16x96xf32>, vector<96x15xf32>, vector<16x15xf32> -> vector<16x15xf32>
    %50 = vector.broadcast %35 : vector<1x15xf32> to vector<16x15xf32>
    %51 = arith.addf %49, %50 : vector<16x15xf32>
    %cst_22 = arith.constant 0.000000e+00 : f32
    %52 = vector.broadcast %cst_22 : f32 to vector<16x15xf32>
    %53 = arith.cmpf ogt, %51, %52 : vector<16x15xf32>
    %54 = vector.broadcast %36 : f32 to vector<16x15xf32>
    %55 = arith.mulf %54, %51 : vector<16x15xf32>
    %56 = arith.select %53, %51, %55 : vector<16x15xi1>, vector<16x15xf32>
    %c0_23 = arith.constant 0 : index
    %c0_24 = arith.constant 0 : index
    %57 = vector.load %arg8[%c0_23, %c0_24] : memref<1x15xf32, #tpu.memory_space<vmem>>, vector<1x15xf32>
    %c2 = arith.constant 2 : index
    %58 = memref.load %arg1[%c2] : memref<4xf32, #tpu.memory_space<smem>>
    %c1_i32_25 = arith.constant 1 : i32
    %59 = tpu.dynamic_rotate %56 by %c1_i32_25 dim 0 : vector<16x15xf32>, i32 -> vector<16x15xf32>
    %cst_26 = arith.constant 0.000000e+00 : f32
    %60 = vector.shape_cast %18 : vector<16x1xi1> to vector<16x1xi1>
    %61 = vector.broadcast %60 : vector<16x1xi1> to vector<16x15xi1>
    %62 = vector.broadcast %cst_26 : f32 to vector<16x15xf32>
    %63 = arith.select %61, %62, %59 : vector<16x15xi1>, vector<16x15xf32>
    %c15_i32_27 = arith.constant 15 : i32
    %64 = tpu.dynamic_rotate %56 by %c15_i32_27 dim 0 : vector<16x15xf32>, i32 -> vector<16x15xf32>
    %cst_28 = arith.constant 0.000000e+00 : f32
    %65 = vector.shape_cast %20 : vector<16x1xi1> to vector<16x1xi1>
    %66 = vector.broadcast %65 : vector<16x1xi1> to vector<16x15xi1>
    %67 = vector.broadcast %cst_28 : f32 to vector<16x15xf32>
    %68 = arith.select %66, %67, %64 : vector<16x15xi1>, vector<16x15xf32>
    %69 = tpu.concatenate %63, %56, %68 in 1 : vector<16x15xf32>, vector<16x15xf32>, vector<16x15xf32> -> vector<16x45xf32>
    %c0_29 = arith.constant 0 : index
    %c0_30 = arith.constant 0 : index
    %70 = vector.load %arg7[%c0_29, %c0_30] : memref<45x15xf32, #tpu.memory_space<vmem>>, vector<45x15xf32>
    %cst_31 = arith.constant dense<0.000000e+00> : vector<16x15xf32>
    %71 = tpu.matmul %69, %70, %cst_31 {dimension_numbers = #tpu.dot_dimension_numbers<[1], [0], [0], [1], [0, 0, 1, 1], [], []>} : vector<16x45xf32>, vector<45x15xf32>, vector<16x15xf32> -> vector<16x15xf32>
    %72 = vector.broadcast %57 : vector<1x15xf32> to vector<16x15xf32>
    %73 = arith.addf %71, %72 : vector<16x15xf32>
    %cst_32 = arith.constant 0.000000e+00 : f32
    %74 = vector.broadcast %cst_32 : f32 to vector<16x15xf32>
    %75 = arith.cmpf ogt, %73, %74 : vector<16x15xf32>
    %76 = vector.broadcast %58 : f32 to vector<16x15xf32>
    %77 = arith.mulf %76, %73 : vector<16x15xf32>
    %78 = arith.select %75, %73, %77 : vector<16x15xi1>, vector<16x15xf32>
    %c0_33 = arith.constant 0 : index
    %c0_34 = arith.constant 0 : index
    %79 = vector.load %arg10[%c0_33, %c0_34] : memref<1x15xf32, #tpu.memory_space<vmem>>, vector<1x15xf32>
    %c3 = arith.constant 3 : index
    %80 = memref.load %arg1[%c3] : memref<4xf32, #tpu.memory_space<smem>>
    %c1_i32_35 = arith.constant 1 : i32
    %81 = tpu.dynamic_rotate %78 by %c1_i32_35 dim 0 : vector<16x15xf32>, i32 -> vector<16x15xf32>
    %cst_36 = arith.constant 0.000000e+00 : f32
    %82 = vector.shape_cast %18 : vector<16x1xi1> to vector<16x1xi1>
    %83 = vector.broadcast %82 : vector<16x1xi1> to vector<16x15xi1>
    %84 = vector.broadcast %cst_36 : f32 to vector<16x15xf32>
    %85 = arith.select %83, %84, %81 : vector<16x15xi1>, vector<16x15xf32>
    %c15_i32_37 = arith.constant 15 : i32
    %86 = tpu.dynamic_rotate %78 by %c15_i32_37 dim 0 : vector<16x15xf32>, i32 -> vector<16x15xf32>
    %cst_38 = arith.constant 0.000000e+00 : f32
    %87 = vector.shape_cast %20 : vector<16x1xi1> to vector<16x1xi1>
    %88 = vector.broadcast %87 : vector<16x1xi1> to vector<16x15xi1>
    %89 = vector.broadcast %cst_38 : f32 to vector<16x15xf32>
    %90 = arith.select %88, %89, %86 : vector<16x15xi1>, vector<16x15xf32>
    %91 = tpu.concatenate %85, %78, %90 in 1 : vector<16x15xf32>, vector<16x15xf32>, vector<16x15xf32> -> vector<16x45xf32>
    %c0_39 = arith.constant 0 : index
    %c0_40 = arith.constant 0 : index
    %92 = vector.load %arg9[%c0_39, %c0_40] : memref<45x15xf32, #tpu.memory_space<vmem>>, vector<45x15xf32>
    %cst_41 = arith.constant dense<0.000000e+00> : vector<16x15xf32>
    %93 = tpu.matmul %91, %92, %cst_41 {dimension_numbers = #tpu.dot_dimension_numbers<[1], [0], [0], [1], [0, 0, 1, 1], [], []>} : vector<16x45xf32>, vector<45x15xf32>, vector<16x15xf32> -> vector<16x15xf32>
    %94 = vector.broadcast %79 : vector<1x15xf32> to vector<16x15xf32>
    %95 = arith.addf %93, %94 : vector<16x15xf32>
    %cst_42 = arith.constant 0.000000e+00 : f32
    %96 = vector.broadcast %cst_42 : f32 to vector<16x15xf32>
    %97 = arith.cmpf ogt, %95, %96 : vector<16x15xf32>
    %98 = vector.broadcast %80 : f32 to vector<16x15xf32>
    %99 = arith.mulf %98, %95 : vector<16x15xf32>
    %100 = arith.select %97, %95, %99 : vector<16x15xi1>, vector<16x15xf32>
    %c1_i32_43 = arith.constant 1 : i32
    %101 = tpu.dynamic_rotate %100 by %c1_i32_43 dim 0 : vector<16x15xf32>, i32 -> vector<16x15xf32>
    %cst_44 = arith.constant 0.000000e+00 : f32
    %102 = vector.shape_cast %18 : vector<16x1xi1> to vector<16x1xi1>
    %103 = vector.broadcast %102 : vector<16x1xi1> to vector<16x15xi1>
    %104 = vector.broadcast %cst_44 : f32 to vector<16x15xf32>
    %105 = arith.select %103, %104, %101 : vector<16x15xi1>, vector<16x15xf32>
    %c15_i32_45 = arith.constant 15 : i32
    %106 = tpu.dynamic_rotate %100 by %c15_i32_45 dim 0 : vector<16x15xf32>, i32 -> vector<16x15xf32>
    %cst_46 = arith.constant 0.000000e+00 : f32
    %107 = vector.shape_cast %20 : vector<16x1xi1> to vector<16x1xi1>
    %108 = vector.broadcast %107 : vector<16x1xi1> to vector<16x15xi1>
    %109 = vector.broadcast %cst_46 : f32 to vector<16x15xf32>
    %110 = arith.select %108, %109, %106 : vector<16x15xi1>, vector<16x15xf32>
    %111 = tpu.concatenate %105, %100, %110 in 1 : vector<16x15xf32>, vector<16x15xf32>, vector<16x15xf32> -> vector<16x45xf32>
    %c0_47 = arith.constant 0 : index
    %c0_48 = arith.constant 0 : index
    %112 = vector.load %arg11[%c0_47, %c0_48] : memref<45x128xf32, #tpu.memory_space<vmem>>, vector<45x128xf32>
    %cst_49 = arith.constant dense<0.000000e+00> : vector<16x128xf32>
    %113 = tpu.matmul %111, %112, %cst_49 {dimension_numbers = #tpu.dot_dimension_numbers<[1], [0], [0], [1], [0, 0, 1, 1], [], []>} : vector<16x45xf32>, vector<45x128xf32>, vector<16x128xf32> -> vector<16x128xf32>
    %c0_50 = arith.constant 0 : index
    %c0_51 = arith.constant 0 : index
    %c0_52 = arith.constant 0 : index
    %114 = vector.load %arg12[%c0_50, %c0_51, %c0_52] : memref<1x16x128xf32, #tpu.memory_space<vmem>>, vector<1x16x128xf32>
    %115 = vector.shape_cast %114 : vector<1x16x128xf32> to vector<16x128xf32>
    %116 = vector.shape_cast %113 : vector<16x128xf32> to vector<1x16x128xf32>
    tpu.vector_store %arg12[%c0_50, %c0_51, %c0_52], %116 {strides = array<i32>} : memref<1x16x128xf32, #tpu.memory_space<vmem>>, vector<1x16x128xf32>,
    return
  }
  func.func @transform_0(%arg0: i32) -> i32 {
    %c0_i32 = arith.constant 0 : i32
    %c0_i32_0 = arith.constant 0 : i32
    return %c0_i32 : i32
  }
  func.func @transform_1(%arg0: i32) -> (i32, i32, i32) {
    %c0_i32 = arith.constant 0 : i32
    %c0_i32_0 = arith.constant 0 : i32
    %c0_i32_1 = arith.constant 0 : i32
    return %arg0, %c0_i32, %c0_i32_0 : i32, i32, i32
  }
  func.func @transform_2(%arg0: i32) -> (i32, i32, i32) {
    %c0_i32 = arith.constant 0 : i32
    %c0_i32_0 = arith.constant 0 : i32
    %c0_i32_1 = arith.constant 0 : i32
    return %arg0, %c0_i32, %c0_i32_0 : i32, i32, i32
  }
  func.func @transform_3(%arg0: i32) -> (i32, i32) {
    %c0_i32 = arith.constant 0 : i32
    %c0_i32_0 = arith.constant 0 : i32
    %c0_i32_1 = arith.constant 0 : i32
    return %c0_i32, %c0_i32_0 : i32, i32
  }
  func.func @transform_4(%arg0: i32) -> (i32, i32) {
    %c0_i32 = arith.constant 0 : i32
    %c0_i32_0 = arith.constant 0 : i32
    %c0_i32_1 = arith.constant 0 : i32
    return %c0_i32, %c0_i32_0 : i32, i32
  }
  func.func @transform_5(%arg0: i32) -> (i32, i32) {
    %c0_i32 = arith.constant 0 : i32
    %c0_i32_0 = arith.constant 0 : i32
    %c0_i32_1 = arith.constant 0 : i32
    return %c0_i32, %c0_i32_0 : i32, i32
  }
  func.func @transform_6(%arg0: i32) -> (i32, i32) {
    %c0_i32 = arith.constant 0 : i32
    %c0_i32_0 = arith.constant 0 : i32
    %c0_i32_1 = arith.constant 0 : i32
    return %c0_i32, %c0_i32_0 : i32, i32
  }
  func.func @transform_7(%arg0: i32) -> (i32, i32) {
    %c0_i32 = arith.constant 0 : i32
    %c0_i32_0 = arith.constant 0 : i32
    %c0_i32_1 = arith.constant 0 : i32
    return %c0_i32, %c0_i32_0 : i32, i32
  }
  func.func @transform_8(%arg0: i32) -> (i32, i32) {
    %c0_i32 = arith.constant 0 : i32
    %c0_i32_0 = arith.constant 0 : i32
    %c0_i32_1 = arith.constant 0 : i32
    return %c0_i32, %c0_i32_0 : i32, i32
  }
  func.func @transform_9(%arg0: i32) -> (i32, i32) {
    %c0_i32 = arith.constant 0 : i32
    %c0_i32_0 = arith.constant 0 : i32
    %c0_i32_1 = arith.constant 0 : i32
    return %c0_i32, %c0_i32_0 : i32, i32
  }
  func.func @transform_10(%arg0: i32) -> (i32, i32) {
    %c0_i32 = arith.constant 0 : i32
    %c0_i32_0 = arith.constant 0 : i32
    %c0_i32_1 = arith.constant 0 : i32
    return %c0_i32, %c0_i32_0 : i32, i32
  }
  func.func @transform_11(%arg0: i32) -> (i32, i32, i32) {
    %c0_i32 = arith.constant 0 : i32
    %c0_i32_0 = arith.constant 0 : i32
    %c0_i32_1 = arith.constant 0 : i32
    return %arg0, %c0_i32, %c0_i32_0 : i32, i32, i32
  }
}

</mosaic_0001>

<bundles_post_ra>
// kernel: tpu_custom_call.1
= control target key start
LH: loop header
LB: loop body
LE: loop exit
PB: predicated region body
PF: predicated region fallthrough
CT: control target
= control target key end

     0   :  { %s1894_s0 = inlined_call_operand.vmem [shape: f32[4], index: 0, kind: input, shape index: {}]   ;;  %s1895_s1 = inlined_call_operand.vmem [shape: f32[2,16,16], index: 1, kind: input, shape index: {}]   ;;  %s1896_s2 = inlined_call_operand.vmem [shape: f32[2,16,32], index: 2, kind: input, shape index: {}]   ;;  %s1897_s3 = inlined_call_operand.vmem [shape: f32[1,32], index: 3, kind: input, shape index: {}]   ;;  %s1898_s4 = inlined_call_operand.vmem [shape: f32[96,15], index: 4, kind: input, shape index: {}]   ;;  %s1899_s5 = inlined_call_operand.vmem [shape: f32[1,15], index: 5, kind: input, shape index: {}]   ;;  %s1900_s6 = inlined_call_operand.vmem [shape: f32[45,15], index: 6, kind: input, shape index: {}]   ;;  %s1901_s7 = inlined_call_operand.vmem [shape: f32[1,15], index: 7, kind: input, shape index: {}]   ;;  %s1902_s8 = inlined_call_operand.vmem [shape: f32[45,15], index: 8, kind: input, shape index: {}]   ;;  %s1903_s9 = inlined_call_operand.vmem [shape: f32[1,15], index: 9, kind: input, shape index: {}]   ;;  %s1904_s10 = inlined_call_operand.vmem [shape: f32[45,128], index: 10, kind: input, shape index: {}]   ;;  %s1905_s11 = inlined_call_operand.hbm [shape: f32[2,16,128], index: 11, kind: output, shape index: {}]  }
   0x1   :  { %1910 = sst [smem:[#allocation8_spill]] %s1894_s0 }
   0x2   :  { %16 = vsyncpa [#allocation4], 0 }
   0x3   :  { %17 = vsyncpa [#allocation3], 0 }
   0x4   :  { %19 = vsyncpa [#allocation3 + $0x1], 0  ;;  %s1571_s17 = smov 0   ;;  %s1573_s18 = smov 0  }
   0x5   :  { %s1575_s19 = smov 0   ;;  %s1577_s20 = smov 0  }
   0x6 LB: > { %s1592_s21 = sadd.s32 4294967295, %s1501_s20   ;;  %s1206_s22 = sadd.s32 4294967294, %s1501_s20   ;;  %s1501_s20 = sphi %s1577_s20, %s1924_s20   ;;  %s1497_s19 = sphi %s1575_s19, %s1923_s19   ;;  %s1493_s18 = sphi %s1573_s18, %s1922_s18   ;;  %s1489_s17 = sphi %s1571_s17, %s1921_s17  }
   0x7   : > { %s1596_s23 = sadd.s32 1, %s1501_s20   ;;  %s273_s24 = sadd.s32 1, %s1497_s19 }
   0x8   : > { %s270_s25 = ssub.s32 %s1501_s20, %s1596_s23  ;;  %p283_p0 = scmp.ne.s32.totalorder %s1497_s19, %s1493_s18 }
   0x9   : > { %p271_p1 = scmp.eq.s32.totalorder %s270_s25, 0  ;;  %p284_p2 = scmp.eq.s32.totalorder %s1592_s21, 1 }
   0xa   : > { %p289_p3 = scmp.ne.s32.totalorder %s1493_s18, %s1489_s17  ;;  %p290_p4 = scmp.eq.s32.totalorder %s1206_s22, 1 }
   0xb   : > { %s1607_s26 = scalar_select %p271_p1, %s1497_s19, %s273_s24  }
   0xc   : > { %p1609_p5 = por %p284_p2, %p283_p0  ;;  %p1613_p6 = por %p290_p4, %p289_p3 }
   0xd   : > { %p1207_p7 = scmp.ge.s32.totalorder %s1501_s20, 1  ;;  %p297_p8 = scmp.lt.s32.totalorder %s1501_s20, 3 }
   0xe   : > { %p1380_p9 = scmp.eq.s32.totalorder %s1592_s21, 0  ;;  %s1914_s0 = sld [smem:[#allocation8_spill]] }
   0xf   : > { %p1620_p10 = pnand %p1207_p7, %p297_p8 }
  0x11   : > { %p1372_p11 = pneg %p1620_p10 }
  0x13   : > { %p1373_p12 = pnand %p1380_p9, %p1372_p11 }
  0x14   : > { %s310_s13 = sshll.u32 %s1914_s0, 4  ;;  %s311_s13 = int_to_ptr.vmem [resolvable:$true] %s310_s13 }
  0x15   : > { %s1422_s14 = scalar_lea.vmem %s311_s13, 16  ;;  %p1424_p0 = pneg %p1373_p12 }
  0x16   : > { %p1423_p13 = scmp.ne.s32.totalorder %s311_s13, %s1422_s14  ;;  %p1430_p3 = scmp.lt.s32.totalorder %s311_s13, %s311_s13 }
  0x17   : > { %p1431_p4 = scmp.lt.s32.totalorder %s1422_s14, %s1422_s14 }
  0x18   : > { %p1425_p1 = pnand %p1424_p0, %p1423_p13 }
  0x19   : > { %p1432_p7 = por %p1431_p4, %p1430_p3 }
  0x1a   : > { %p1426_p2 = pneg %p1425_p1 }
  0x1c   : > { %p1433_p8 = pnand %p1432_p7, %p1426_p2 }
  0x1e   : > { %1436 = shalt.err (!%p1433_p8)
}
  0x1f   : > { %s1503_s15 = smov [#allocation2]   ;;  %363 = sbr.rel (%p1620_p10) target bundleno = 1545 (0x609), region = 64 }
  0x20   : > { %1375 = dma.vmem_to_smem (!%p1373_p12), %s311_s13, 16, %s1503_s15, [#allocation4]  }
  0x24   : > { %1480 = dma.done.wait (%p1380_p9), [#allocation4], 16  }
  0x25   : > { %1482 = vsyncadd (%p1380_p9), [#allocation4], 4294967280 }
  0x26   : > { %369 = sfence }
  0x27   : > { %p409_p11 = scmp.lt.s32.totalorder %s1592_s21, 1  ;;  %vm461_vm0 = vcmask 130048   ;;  %v608_v4 = vld [vmem:[%s1898_s4 + $0x58] sm:$0xff]  ;;  %v607_v5 = vld [vmem:[%s1898_s4 + $0x50] sm:$0xff]  ;;  %v606_v6 = vld [vmem:[%s1898_s4 + $0x48] sm:$0xff]  ;;  %v419_v13 = vlaneseq  ;;  %s1505_s29 = smov 64  }
  0x28   : > { %1294 = vmatprep.subr.mxu1 %v608_v4  ;;  %v605_v7 = vld [vmem:[%s1898_s4 + $0x40] sm:$0xff]  ;;  %v604_v8 = vld [vmem:[%s1898_s4 + $0x38] sm:$0xff]  ;;  %v603_v9 = vld [vmem:[%s1898_s4 + $0x30] sm:$0xff]  ;;  %vm591_vm7 = vcmask 261120   ;;  %vm594_vm8 = vcmask 523264   ;;  %vm615_vm9 = vcmask 785408  }
  0x29   : > { %s410_s16 = scalar_select %p409_p11, %s1592_s21, 1  ;;  %1295 = vmatpush3.msra.mxu1 %v608_v4  ;;  %v602_v10 = vld [vmem:[%s1898_s4 + $0x28] sm:$0xff]  ;;  %v601_v11 = vld [vmem:[%s1898_s4 + $0x20] sm:$0xff]  ;;  %v600_v12 = vld [vmem:[%s1898_s4 + $0x18] sm:$0xff]  ;;  %v1681_v17 = vshrl.u32 %v419_v13, 7  ;;  %vm759_vm10 = vcmask 1044480  }
  0x2a   : > { %1296 = vmatprep.subr.mxu1 %v607_v5  ;;  %v599_v14 = vld [vmem:[%s1898_s4 + $0x10] sm:$0xff]  ;;  %v1217_v15 = vld [vmem:[%s1897_s3] ss:$0 sm:$0xff]  ;;  %v598_v16 = vld [vmem:[%s1898_s4 + $0x8] sm:$0xff]  ;;  %s1220_s24 = sld [smem:[#allocation2 + $0x1]]  ;;  %s1908_s25 = smov 15  }
  0x2b   : > { %s1242_s22 = sshll.u32 %s410_s16, 4  ;;  %1297 = vmatpush3.msra.mxu1 %v607_v5  ;;  %v597_v18 = vld [vmem:[%s1898_s4] sm:$0xff]  ;;  %v421_v25 = vadd.s32 8, %v1681_v17  ;;  %vm566_vm3 = vcmp.lt.s32.totalorder %v1681_v17, 7  ;;  %vm555_vm4 = vcmp.lt.s32.totalorder %v1681_v17, 1  ;;  %v426_v40 = vand.u32 15, %v1681_v17 }
  0x2c   : > { %s418_s30 = scalar_lea.vmem %s1896_s2, %s1242_s22  ;;  %s413_s13 = scalar_lea.vmem %s1895_s1, %s1242_s22  ;;  %1298 = vmatprep.subr.mxu1 %v606_v6  ;;  %v745_v51 = vld [vmem:[%s1900_s6 + $0x28] sm:$0x1f]  ;;  %v744_v52 = vld [vmem:[%s1900_s6 + $0x20] sm:$0xff]  ;;  %v743_v53 = vld [vmem:[%s1900_s6 + $0x18] sm:$0xff]  ;;  %vm734_vm13 = vcmask 121856   ;;  %vm737_vm14 = vcmask 244736  }
  0x2d   : > { %v453_v0 = vld [vmem:[%s418_s30 + $0x8] sm:$0xff]  ;;  %v452_v1 = vld [vmem:[%s418_s30] sm:$0xff]  ;;  %1299 = vmatpush3.msra.mxu1 %v606_v6  ;;  %s543_s30 = sld [smem:[#allocation2]]  ;;  %v433_v29 = vand.u32 15, %v421_v25  ;;  %vm1704_vm6 = vcmp.eq.s32.totalorder %v426_v40, 0  ;;  %v742_v54 = vld [vmem:[%s1900_s6 + $0x10] sm:$0xff] }
  0x2e   : > { %v450_v2 = vld [vmem:[%s413_s13] sm:$0xff]  ;;  %1287 = vmatprep.subr.mxu0 %v453_v0  ;;  %v451_v3 = vld [vmem:[%s413_s13 + $0x8] sm:$0xff]  ;;  %1300 = vmatprep.subr.mxu1 %v605_v7  ;;  %vm752_vm15 = vcmask 367616   ;;  %s1224_s14 = sld [smem:[#allocation2 + $0x2]]  ;;  %v881_v25 = vld [vmem:[%s1902_s8 + $0x10] sm:$0xff]  ;;  %s1920_s16 = smov 15  }
  0x2f   : > { %1291 = vmatprep.mubr.msk.f32.mxu0 %vm461_vm0, %v450_v2  ;;  %1288 = vmatpush3.msra.mxu0 %v453_v0  ;;  %vm1695_vm5 = vcmp.eq.s32.totalorder %v433_v29, 15  ;;  %v741_v55 = vld [vmem:[%s1900_s6 + $0x8] sm:$0xff]  ;;  %v1221_v56 = vld [vmem:[%s1899_s5] ss:$0 sm:$0xff]  ;;  %s1244_s22 = sshll.u32 %s1592_s21, 8  ;;  %s1508_s21 = smov [#allocation5]  }
  0x30   : > { %1289 = vmatprep.subr.mxu0 %v452_v1  ;;  %1301 = vmatpush3.msra.mxu1 %v605_v7  ;;  %v740_v57 = vld [vmem:[%s1900_s6] sm:$0xff]  ;;  %v699_v59 = vstv %s1220_s24  ;;  %s1906_s24 = smov 30   ;;  %s1852_s13 = scalar_lea.hbm %s1905_s11, %s1244_s22 }
  0x31   : > { %1290 = vmatpush3.msra.mxu0 %v452_v1  ;;  %1302 = vmatprep.subr.mxu1 %v604_v8 }
  0x32   : > { %1292 = vmatmul.mubr.msk.f32.vlgmr.msra.gmra.mxu0 %vm461_vm0, %v451_v3  ;;  %1303 = vmatpush3.msra.mxu1 %v604_v8 }
  0x33   : > { %1304 = vmatprep.subr.mxu1 %v603_v9  ;;  %v546_v20 = vstv %s543_s30  ;;  %s1504_s30 = smov 32   ;;  %1321 = vmatprep.subr.msk.mxu0 %vm759_vm10, %v745_v51 }
  0x34   : > { %1305 = vmatpush3.msra.mxu1 %v603_v9  ;;  %1322 = vmatpush3.msk.msra.mxu0 %vm759_vm10, %v745_v51 }
  0x35   : > { %1306 = vmatprep.subr.mxu1 %v602_v10  ;;  %1323 = vmatprep.subr.mxu0 %v744_v52 }
  0x36   : > { %1307 = vmatpush3.msra.mxu1 %v602_v10  ;;  %1324 = vmatpush3.msra.mxu0 %v744_v52 }
  0x37   : > { %1308 = vmatprep.subr.mxu1 %v601_v11  ;;  %1325 = vmatprep.subr.mxu0 %v743_v53 }
  0x38   : > { %1309 = vmatpush3.msra.mxu1 %v601_v11  ;;  %1326 = vmatpush3.msra.mxu0 %v743_v53 }
  0x39   : > { %1310 = vmatprep.subr.mxu1 %v600_v12  ;;  %1327 = vmatprep.subr.mxu0 %v742_v54 }
  0x3a   : > { %1311 = vmatpush3.msra.mxu1 %v600_v12  ;;  %1328 = vmatpush3.msra.mxu0 %v742_v54 }
  0x3b   : > { %1312 = vmatprep.subr.mxu1 %v599_v14  ;;  %1329 = vmatprep.subr.mxu0 %v741_v55 }
  0x3c   : > { %1313 = vmatpush3.msra.mxu1 %v599_v14  ;;  %1330 = vmatpush3.msra.mxu0 %v741_v55 }
  0x3d   : > { %1314 = vmatprep.subr.mxu1 %v598_v16  ;;  %1331 = vmatprep.subr.mxu0 %v740_v57 }
  0x3e   : > { %1315 = vmatpush3.msra.mxu1 %v598_v16  ;;  %1332 = vmatpush3.msra.mxu0 %v740_v57 }
  0x3f   : > { %1316 = vmatprep.subr.mxu1 %v597_v18 }
  0x40   : > { %1317 = vmatpush3.msra.mxu1 %v597_v18 }
  0xf2   : > { %v1293_v19 = vpop.f32.mrf.mxu0 }
  0xf3   : > { %v540_v21 = vadd.f32 %v1293_v19, %v1217_v15 }
  0xf4   : > { %v534_v22 = vpop.f32.mrf.mxu0 }
  0xf5   : > { %vm545_vm1 = vcmp.gt.f32.partialorder %v540_v21, 0.0  ;;  %v548_v23 = vmul.f32 %v546_v20, %v540_v21  ;;  %v535_v24 = vadd.f32 %v1217_v15, %v534_v22  ;;  %v884_v22 = vld [vmem:[%s1902_s8 + $0x28] sm:$0x1f] }
  0xf6   : > { %1336 = vmatprep.subr.msk.mxu0 %vm759_vm10, %v884_v22 }
  0xf7   : > { %v550_v26 = vsel %vm545_vm1, %v540_v21, %v548_v23  ;;  %v547_v27 = vmul.f32 %v546_v20, %v535_v24  ;;  %vm544_vm2 = vcmp.gt.f32.partialorder %v535_v24, 0.0  ;;  %v883_v23 = vld [vmem:[%s1902_s8 + $0x20] sm:$0xff] }
  0xf8   : > { %v554_v30 = vrot.slane %v550_v26, 7  ;;  %v565_v33 = vrot.slane %v550_v26, 1 }
  0xf9   : > { %v549_v28 = vsel %vm544_vm2, %v535_v24, %v547_v27  ;;  %v882_v24 = vld [vmem:[%s1902_s8 + $0x18] sm:$0xff]  ;;  %v1225_v27 = vld [vmem:[%s1901_s7] ss:$0 sm:$0xff] }
  0xfa   : > { %577 = vrot.lane.b32.xlu0 %v549_v28, %s1504_s30  ;;  %v553_v31 = vrot.slane %v549_v28, 7  ;;  %v564_v32 = vrot.slane %v549_v28, 1  ;;  %v879_v28 = vld [vmem:[%s1902_s8] sm:$0xff] }
  0xfc   : > { %v567_v34 = vsel %vm566_vm3, %v564_v32, %v565_v33  ;;  %v557_v35 = vsel %vm555_vm4, %v554_v30, %v553_v31  ;;  %v556_v36 = vsel %vm555_vm4, %v553_v31, %v554_v30  ;;  %v568_v38 = vsel %vm566_vm3, %v565_v33, %v564_v32 }
  0xfd   : > { %585 = vrot.lane.b32.xlu1 %v567_v34, %s1505_s29  ;;  %v574_v39 = vsel %vm1695_vm5, 0.0, %v568_v38  ;;  %v562_v43 = vsel %vm1704_vm6, 0.0, %v557_v35  ;;  %v840_v30 = vstv %s1224_s14 }
  0xfe   : > { %579 = vrot.lane.b32.xlu0 %v550_v26, %s1504_s30  ;;  %v880_v26 = vld [vmem:[%s1902_s8 + $0x8] sm:$0xff] }
 0x101   : > { %587 = vrot.lane.b32.xlu1 %v574_v39, %s1505_s29  ;;  %s1229_s29 = sld [smem:[#allocation2 + $0x3]] }
 0x16c   : > { %v578_v42 = vpop.permute.xlu0 %577 }
 0x16d   : > { %v592_v44 = vsel %vm591_vm7, %v562_v43, %v578_v42 }
 0x16f   : > { %v586_v45 = vpop.permute.xlu1 %585 }
 0x170   : > { %v580_v46 = vpop.permute.xlu0 %579  ;;  %v595_v47 = vsel %vm594_vm8, %v592_v44, %v586_v45 }
 0x171   : > { %1318 = vmatprep.mubr.msk.f32.mxu1 %vm615_vm9, %v595_v47  ;;  %v593_v48 = vsel %vm591_vm7, %v556_v36, %v580_v46 }
 0x173   : > { %v588_v49 = vpop.permute.xlu1 %587 }
 0x174   : > { %v596_v50 = vsel %vm594_vm8, %v593_v48, %v588_v49 }
 0x175   : > { %1319 = vmatmul.mubr.msk.f32.vlgmr.msra.gmra.mxu1 %vm615_vm9, %v596_v50 }
 0x235   : > { %v1320_v58 = vpop.f32.mrf.mxu1 }
 0x236   : > { %v694_v60 = vadd.f32 %v1320_v58, %v1221_v56  ;;  %v1019_v58 = vld [vmem:[%s1904_s10 + $0x28] sm:$0x1f] }
 0x237   : > { %v688_v61 = vpop.f32.mrf.mxu1  ;;  %1351 = vmatprep.subr.msk.mxu1 %vm759_vm10, %v1019_v58 }
 0x238   : > { %v701_v62 = vmul.f32 %v699_v59, %v694_v60  ;;  %v689_v63 = vadd.f32 %v1221_v56, %v688_v61  ;;  %vm698_vm11 = vcmp.gt.f32.partialorder %v694_v60, 0.0  ;;  %1352 = vmatpush3.msk.msra.mxu1 %vm759_vm10, %v1019_v58  ;;  %v1016_v61 = vld [vmem:[%s1904_s10 + $0x10] sm:$0xff] }
 0x23a   : > { %v700_v0 = vmul.f32 %v699_v59, %v689_v63  ;;  %v703_v1 = vsel %vm698_vm11, %v694_v60, %v701_v62  ;;  %vm697_vm12 = vcmp.gt.f32.partialorder %v689_v63, 0.0  ;;  %v1018_v59 = vld [vmem:[%s1904_s10 + $0x20] sm:$0xff]  ;;  %v1017_v60 = vld [vmem:[%s1904_s10 + $0x18] sm:$0xff]  ;;  %v1015_v62 = vld [vmem:[%s1904_s10 + $0x8] sm:$0xff] }
 0x23b   : > { %722 = vrot.lane.b32.xlu1 %v703_v1, %s1908_s25  ;;  %v707_v3 = vrot.slane %v703_v1, 7  ;;  %v713_v4 = vrot.slane %v703_v1, 1  ;;  %1353 = vmatprep.subr.mxu1 %v1018_v59 }
 0x23c   : > { %v702_v2 = vsel %vm697_vm12, %v689_v63, %v700_v0  ;;  %1354 = vmatpush3.msra.mxu1 %v1018_v59  ;;  %v1230_v63 = vld [vmem:[%s1903_s9] ss:$0 sm:$0xff] }
 0x23d   : > { %720 = vrot.lane.b32.xlu0 %v702_v2, %s1908_s25  ;;  %v706_v5 = vrot.slane %v702_v2, 7  ;;  %v712_v6 = vrot.slane %v702_v2, 1  ;;  %1355 = vmatprep.subr.mxu1 %v1017_v60  ;;  %v1014_v0 = vld [vmem:[%s1904_s10] sm:$0xff]  ;;  %v977_v2 = vstv %s1229_s29 }
 0x23e   : > { %1356 = vmatpush3.msra.mxu1 %v1017_v60 }
 0x23f   : > { %v715_v7 = vsel %vm566_vm3, %v713_v4, %v712_v6  ;;  %v714_v8 = vsel %vm566_vm3, %v712_v6, %v713_v4  ;;  %v708_v9 = vsel %vm555_vm4, %v706_v5, %v707_v3  ;;  %v709_v10 = vsel %vm555_vm4, %v707_v3, %v706_v5  ;;  %1357 = vmatprep.subr.mxu1 %v1016_v61 }
 0x240   : > { %v717_v11 = vsel %vm1695_vm5, 0.0, %v715_v7  ;;  %v710_v14 = vsel %vm1704_vm6, 0.0, %v709_v10  ;;  %1358 = vmatpush3.msra.mxu1 %v1016_v61 }
 0x241   : > { %730 = vrot.lane.b32.xlu1 %v717_v11, %s1906_s24  ;;  %728 = vrot.lane.b32.xlu0 %v714_v8, %s1906_s24  ;;  %s1919_s24 = smov 30  }
 0x242   : > { %1359 = vmatprep.subr.mxu1 %v1015_v62 }
 0x243   : > { %1360 = vmatpush3.msra.mxu1 %v1015_v62 }
 0x244   : > { %1361 = vmatprep.subr.mxu1 %v1014_v0 }
 0x245   : > { %1362 = vmatpush3.msra.mxu1 %v1014_v0 }
 0x2ad   : > { %v723_v12 = vpop.permute.xlu1 %722 }
 0x2ae   : > { %v736_v15 = vsel %vm734_vm13, %v708_v9, %v723_v12 }
 0x2af   : > { %v721_v13 = vpop.permute.xlu0 %720 }
 0x2b0   : > { %v735_v16 = vsel %vm734_vm13, %v710_v14, %v721_v13 }
 0x2b3   : > { %v731_v18 = vpop.permute.xlu1 %730  ;;  %v729_v19 = vpop.permute.xlu0 %728 }
 0x2b4   : > { %v739_v20 = vsel %vm737_vm14, %v736_v15, %v731_v18  ;;  %v738_v21 = vsel %vm737_vm14, %v735_v16, %v729_v19 }
 0x2b5   : > { %1333 = vmatprep.mubr.msk.f32.mxu0 %vm752_vm15, %v738_v21 }
 0x2b6   : > { %1334 = vmatmul.mubr.msk.f32.vlgmr.msra.gmra.mxu0 %vm752_vm15, %v739_v20 }
 0x2b7   : > { %1337 = vmatpush3.msk.msra.mxu0 %vm759_vm10, %v884_v22 }
 0x2b8   : > { %1338 = vmatprep.subr.mxu0 %v883_v23 }
 0x2b9   : > { %1339 = vmatpush3.msra.mxu0 %v883_v23 }
 0x2ba   : > { %1340 = vmatprep.subr.mxu0 %v882_v24 }
 0x2bb   : > { %1341 = vmatpush3.msra.mxu0 %v882_v24 }
 0x2bc   : > { %1342 = vmatprep.subr.mxu0 %v881_v25 }
 0x2bd   : > { %1343 = vmatpush3.msra.mxu0 %v881_v25 }
 0x2be   : > { %1344 = vmatprep.subr.mxu0 %v880_v26 }
 0x2bf   : > { %1345 = vmatpush3.msra.mxu0 %v880_v26 }
 0x2c0   : > { %1346 = vmatprep.subr.mxu0 %v879_v28 }
 0x2c1   : > { %1347 = vmatpush3.msra.mxu0 %v879_v28 }
 0x376   : > { %v1335_v29 = vpop.f32.mrf.mxu0 }
 0x377   : > { %v835_v31 = vadd.f32 %v1335_v29, %v1225_v27 }
 0x378   : > { %v829_v32 = vpop.f32.mrf.mxu0 }
 0x379   : > { %v842_v33 = vmul.f32 %v840_v30, %v835_v31  ;;  %v830_v34 = vadd.f32 %v1225_v27, %v829_v32  ;;  %vm839_vm0 = vcmp.gt.f32.partialorder %v835_v31, 0.0 }
 0x37b   : > { %v841_v35 = vmul.f32 %v840_v30, %v830_v34  ;;  %v844_v36 = vsel %vm839_vm0, %v835_v31, %v842_v33  ;;  %vm838_vm1 = vcmp.gt.f32.partialorder %v830_v34, 0.0 }
 0x37c   : > { %863 = vrot.lane.b32.xlu1 %v844_v36, %s1908_s25  ;;  %v848_v39 = vrot.slane %v844_v36, 7  ;;  %v854_v40 = vrot.slane %v844_v36, 1 }
 0x37d   : > { %v843_v38 = vsel %vm838_vm1, %v830_v34, %v841_v35 }
 0x37e   : > { %861 = vrot.lane.b32.xlu0 %v843_v38, %s1908_s25  ;;  %v847_v42 = vrot.slane %v843_v38, 7  ;;  %v853_v43 = vrot.slane %v843_v38, 1  ;;  %s406_s25 = sand.u32 1, %s1493_s18  }
 0x37f   : > { %s1854_s15 = scalar_lea.sflag [#allocation3], %s406_s25 }
 0x380   : > { %v856_v44 = vsel %vm566_vm3, %v854_v40, %v853_v43  ;;  %v855_v45 = vsel %vm566_vm3, %v853_v43, %v854_v40  ;;  %v849_v46 = vsel %vm555_vm4, %v847_v42, %v848_v39  ;;  %v850_v47 = vsel %vm555_vm4, %v848_v39, %v847_v42 }
 0x381   : > { %v858_v48 = vsel %vm1695_vm5, 0.0, %v856_v44  ;;  %v851_v51 = vsel %vm1704_vm6, 0.0, %v850_v47 }
 0x382   : > { %871 = vrot.lane.b32.xlu1 %v858_v48, %s1919_s24  ;;  %869 = vrot.lane.b32.xlu0 %v855_v45, %s1919_s24 }
 0x3ee   : > { %v864_v49 = vpop.permute.xlu1 %863 }
 0x3ef   : > { %v876_v52 = vsel %vm734_vm13, %v849_v46, %v864_v49 }
 0x3f0   : > { %v862_v50 = vpop.permute.xlu0 %861 }
 0x3f1   : > { %v875_v53 = vsel %vm734_vm13, %v851_v51, %v862_v50 }
 0x3f4   : > { %v872_v54 = vpop.permute.xlu1 %871  ;;  %v870_v55 = vpop.permute.xlu0 %869 }
 0x3f5   : > { %v878_v56 = vsel %vm737_vm14, %v876_v52, %v872_v54  ;;  %v877_v57 = vsel %vm737_vm14, %v875_v53, %v870_v55 }
 0x3f6   : > { %1348 = vmatprep.mubr.msk.f32.mxu0 %vm752_vm15, %v877_v57 }
 0x3f7   : > { %1349 = vmatmul.mubr.msk.f32.vlgmr.msra.gmra.mxu0 %vm752_vm15, %v878_v56 }
 0x4b7   : > { %v1350_v1 = vpop.f32.mrf.mxu0 }
 0x4b8   : > { %v972_v3 = vadd.f32 %v1350_v1, %v1230_v63 }
 0x4b9   : > { %v966_v4 = vpop.f32.mrf.mxu0 }
 0x4ba   : > { %v979_v5 = vmul.f32 %v977_v2, %v972_v3  ;;  %v967_v6 = vadd.f32 %v1230_v63, %v966_v4  ;;  %vm976_vm2 = vcmp.gt.f32.partialorder %v972_v3, 0.0 }
 0x4bc   : > { %v978_v7 = vmul.f32 %v977_v2, %v967_v6  ;;  %v981_v8 = vsel %vm976_vm2, %v972_v3, %v979_v5  ;;  %vm975_vm7 = vcmp.gt.f32.partialorder %v967_v6, 0.0 }
 0x4bd   : > { %998 = vrot.lane.b32.xlu1 %v981_v8, %s1920_s16  ;;  %v983_v10 = vrot.slane %v981_v8, 7  ;;  %v989_v11 = vrot.slane %v981_v8, 1 }
 0x4be   : > { %v980_v9 = vsel %vm975_vm7, %v967_v6, %v978_v7 }
 0x4bf   : > { %996 = vrot.lane.b32.xlu0 %v980_v9, %s1920_s16  ;;  %v982_v12 = vrot.slane %v980_v9, 7  ;;  %v988_v13 = vrot.slane %v980_v9, 1 }
 0x4c1   : > { %v991_v14 = vsel %vm566_vm3, %v989_v11, %v988_v13  ;;  %v990_v15 = vsel %vm566_vm3, %v988_v13, %v989_v11  ;;  %v984_v16 = vsel %vm555_vm4, %v982_v12, %v983_v10  ;;  %v985_v18 = vsel %vm555_vm4, %v983_v10, %v982_v12 }
 0x4c2   : > { %v993_v19 = vsel %vm1695_vm5, 0.0, %v991_v14  ;;  %v986_v22 = vsel %vm1704_vm6, 0.0, %v985_v18 }
 0x4c3   : > { %1006 = vrot.lane.b32.xlu1 %v993_v19, %s1919_s24  ;;  %1004 = vrot.lane.b32.xlu0 %v990_v15, %s1919_s24  ;;  %s1212_s24 = sshll.u32 %s406_s25, 4 }
 0x4c4   : > { %s408_s29 = scalar_lea.vmem [#allocation5], %s1212_s24  ;;  %s1441_s24 = sshll.u32 %s1508_s21, 4  ;;  %s1442_s24 = int_to_ptr.vmem [resolvable:$false] %s1441_s24 }
 0x4c5   : > { %s1120_s14 = sshll.u32 %s408_s29, 4  ;;  %s1443_s0 = scalar_lea.vmem %s1442_s24, 512  ;;  %s1847_s14 = int_to_ptr.vmem [resolvable:$true] %s1120_s14 }
 0x4c6   : > { %s1437_s16 = scalar_lea.vmem %s1847_s14, 256  ;;  %p1444_p13 = scmp.lt.s32.totalorder %s1847_s14, %s1442_s24 }
 0x4c7   : > { %p1438_p9 = scmp.ne.s32.totalorder %s1847_s14, %s1437_s16  ;;  %p1445_p0 = scmp.lt.s32.totalorder %s1443_s0, %s1437_s16 }
 0x4c9   : > { %p1439_p10 = pnand %p1438_p9, %p1609_p5  ;;  %p1446_p1 = por %p1445_p0, %p1444_p13 }
 0x4cb   : > { %p1440_p12 = pneg %p1439_p10 }
 0x4cd   : > { %p1447_p2 = pnand %p1446_p1, %p1440_p12 }
 0x52f   : > { %v999_v20 = vpop.permute.xlu1 %998 }
 0x530   : > { %v1011_v23 = vsel %vm734_vm13, %v984_v16, %v999_v20 }
 0x531   : > { %v997_v21 = vpop.permute.xlu0 %996 }
 0x532   : > { %v1010_v24 = vsel %vm734_vm13, %v986_v22, %v997_v21 }
 0x535   : > { %v1007_v17 = vpop.permute.xlu1 %1006  ;;  %v1005_v25 = vpop.permute.xlu0 %1004 }
 0x536   : > { %v1013_v26 = vsel %vm737_vm14, %v1011_v23, %v1007_v17  ;;  %v1012_v37 = vsel %vm737_vm14, %v1010_v24, %v1005_v25 }
 0x537   : > { %1363 = vmatprep.mubr.msk.f32.mxu1 %vm752_vm15, %v1012_v37 }
 0x538   : > { %1364 = vmatmul.mubr.msk.f32.vlgmr.msra.gmra.mxu1 %vm752_vm15, %v1013_v26 }
 0x5f8   : > { %v1365_v41 = vpop.f32.mrf.mxu1 }
 0x5f9   : > { %1105 = vst [vmem:[%s408_s29 + $0x8] sm:$0xff] %v1365_v41 }
 0x5fa   : > { %v1095_v27 = vpop.f32.mrf.mxu1 }
 0x5fb   : > { %1104 = vst [vmem:[%s408_s29] sm:$0xff] %v1095_v27 }
 0x5fc   : > { %1450 = shalt.err (!%p1447_p2)
}
 0x5fd   : > { %s1451_s25 = scalar_lea.hbm %s1852_s13, 256  ;;  %s1455_s12 = scalar_lea.hbm %s1905_s11, 512 }
 0x5fe   : > { %p1452_p3 = scmp.ne.s32.totalorder %s1852_s13, %s1451_s25  ;;  %p1456_p8 = scmp.lt.s32.totalorder %s1852_s13, %s1905_s11 }
 0x5ff   : > { %p1457_p11 = scmp.lt.s32.totalorder %s1455_s12, %s1451_s25 }
 0x600   : > { %p1453_p4 = pnand %p1452_p3, %p1609_p5 }
 0x601   : > { %p1458_p9 = por %p1457_p11, %p1456_p8 }
 0x602   : > { %p1454_p7 = pneg %p1453_p4 }
 0x604   : > { %p1459_p10 = pnand %p1458_p9, %p1454_p7 }
 0x606   : > { %1462 = shalt.err (!%p1459_p10)
}
 0x607   : > { %s1509_s0 = smov 128   ;;  %s1510_s16 = smov 8  }
 0x608   : > { %1370 = dma.vmem_to_hbm [thread:$0]  (%p1609_p5), %s1847_s14, 256, %s1852_s13, %s1854_s15, %s1509_s0, %s1509_s0, %s1510_s16  }
 0x609 PF: > { %p1382_p12 = scmp.ge.s32.totalorder %s1501_s20, 2  ;;  %s1135_s24 = sand.u32 1, %s1489_s17  }
 0x60a   : > { %s1136_s25 = scalar_lea.sflag [#allocation3], %s1135_s24 }
 0x60b   : > { %p1377_p13 = pnand %p1382_p12, %p1613_p6 }
 0x60d   : > { %p1378_p0 = pneg %p1377_p13 }
 0x60f   : > { %1484 = dma.done.wait (%p1378_p0), %s1136_s25, 256  }
 0x610   : > { %1486 = vsyncadd (%p1378_p0), %s1136_s25, 4294967040  ;;  %p22_p1 = scmp.ge.s32.totalorder %s1596_s23, 4   ;;  %s1921_s17 = smov %s1493_s18 }
 0x611   : > { %s1922_s18 = smov %s1497_s19  ;;  %s1923_s19 = smov %s1607_s26 }
 0x612   : > { %s1924_s20 = smov %s1596_s23  ;;  %24 = sbr.rel (!%p22_p1) target bundleno = 6 (0x6), region = 107 }
 0x617   :  { %1141 = vsyncpa [#allocation3], 1 }
 0x618   :  { %1143 = vsyncpa [#allocation3 + $0x1], 1 }
 0x619   :  { %1144 = vsyncpa [#allocation4], 1 }
 0x61a   :  { %1146 = vsyncpa [#allocation4 + $0x1], 1 }

</bundles_post_ra>
